<compile_context>
chip_gen: v5e
topology: v5e:2x2
jax: 0.10.0
libtpu: 0.0.40
codegen_flags: <defaults>
</compile_context>

<pallas_src>
import jax
import jax.numpy as jnp
from jax.experimental import pallas as pl
from jax.experimental.pallas import tpu as pltpu


def _ce_kernel(logits_ref, tgt_ref, out_ref):
    # logits_ref: (1, C, T)  float  - classes on sublanes, pixels on lanes (lane-dense)
    # tgt_ref:    (1, 1, T)  int32  - class indices; negative => ignored / padding
    # out_ref:    (1, 128)   f32    - lane-dense per-tile partial sum (partial/128 broadcast)
    x = logits_ref[0].astype(jnp.float32)            # (C, T)
    t = tgt_ref[0]                                   # (1, T)

    # Numerically stable log-sum-exp over the class (sublane) axis.
    m = jnp.max(x, axis=0, keepdims=True)            # (1, T)
    lse = jnp.log(jnp.sum(jnp.exp(x - m), axis=0, keepdims=True)) + m  # (1, T)

    # Gather the target-class logit: small (C, 1) class iota, broadcast compare over lanes.
    cls = jax.lax.broadcasted_iota(jnp.int32, (x.shape[0], 1), 0)      # (C, 1)
    tgt_logit = jnp.sum(jnp.where(cls == t, x, 0.0), axis=0, keepdims=True)  # (1, T)

    valid = t >= 0
    loss = jnp.where(valid, lse - tgt_logit, 0.0)    # (1, T) per-pixel NLL (0 where ignored)

    # One cross-lane reduce per tile; emit a lane-dense (1, 128) block whose element sum
    # equals the tile partial exactly (divide by a power of two, then broadcast).
    partial = jnp.sum(loss)
    out_ref[...] = jnp.full((1, 128), partial * (1.0 / 128.0), dtype=jnp.float32)


def _pick_hw_tile(hw, c, target_bytes=2 << 20):
    """Largest lane-aligned H*W tile keeping the logits block near `target_bytes`
    and dividing the (possibly padded) H*W extent."""
    budget = max(128, ((target_bytes // (c * 4)) // 128) * 128)
    if hw % 128 == 0:
        for t in range(min(budget, hw), 0, -128):
            if hw % t == 0:
                return t, hw                          # no padding needed
    hw_aligned = ((hw + 127) // 128) * 128
    t = min(budget, hw_aligned)
    hw_pad = ((hw + t - 1) // t) * t
    return t, hw_pad


def cross_entropy(prediction, target):
    """prediction: (N, C, H, W) float logits (f32 or bf16); target: (N, H, W) int.

    Returns the scalar mean cross-entropy, matching torch.nn.CrossEntropyLoss(weight=None).
    Negative targets (e.g. ignore_index=-100) are excluded from both the sum and the count.
    """
    N, C, H, W = prediction.shape
    HW = H * W
    t_hw, hw_pad = _pick_hw_tile(HW, C)

    # Free reshapes of the NCHW layout: H*W on the lane axis, classes on sublanes.
    logits = prediction.reshape(N, C, HW)
    tgt = target.reshape(N, 1, HW).astype(jnp.int32)
    if hw_pad != HW:
        # Rare ragged case: pad pixels with zero logits and a sentinel (-1) target.
        logits = jnp.pad(logits, ((0, 0), (0, 0), (0, hw_pad - HW)))
        tgt = jnp.pad(tgt, ((0, 0), (0, 0), (0, hw_pad - HW)), constant_values=-1)

    n_hw_tiles = hw_pad // t_hw
    grid = (N, n_hw_tiles)
    n_tiles = N * n_hw_tiles

    # Double-buffered logits + target blocks, tiny output block; leave generous headroom
    # but stay well under v7x's 64 MiB physical VMEM.
    block_bytes = C * t_hw * 4 + t_hw * 4 + 128 * 4
    vmem_limit = int(min(max(32 << 20, 6 * block_bytes), 48 << 20))

    partials = pl.pallas_call(
        _ce_kernel,
        out_shape=jax.ShapeDtypeStruct((1, n_tiles * 128), jnp.float32),
        grid_spec=pltpu.PrefetchScalarGridSpec(
            num_scalar_prefetch=0,
            grid=grid,
            in_specs=[
                pl.BlockSpec((1, C, t_hw), lambda n, h: (n, 0, h)),
                pl.BlockSpec((1, 1, t_hw), lambda n, h: (n, 0, h)),
            ],
            out_specs=pl.BlockSpec((1, 128), lambda n, h: (0, n * n_hw_tiles + h)),
        ),
        compiler_params=pltpu.CompilerParams(
            dimension_semantics=("parallel", "parallel"),
            vmem_limit_bytes=vmem_limit,
        ),
    )(logits, tgt)

    total = jnp.sum(partials)                               # pairwise sum of per-tile partials
    valid_count = jnp.sum((target >= 0).astype(jnp.float32))
    return total / valid_count


def _reference_cross_entropy(prediction, target):
    # Pure-JAX reference matching torch.nn.CrossEntropyLoss(weight=None) semantics.
    N, C, H, W = prediction.shape
    logits = jnp.transpose(prediction, (0, 2, 3, 1)).reshape(-1, C).astype(jnp.float32)
    tgt = target.reshape(-1)
    logp = jax.nn.log_softmax(logits, axis=-1)
    nll = -jnp.take_along_axis(logp, tgt[:, None], axis=-1)[:, 0]
    return jnp.mean(nll)


if __name__ == "__main__":
    key = jax.random.PRNGKey(0)
    k1, k2 = jax.random.split(key)

    # prediction: (N, C, H, W) logits; target: (N, H, W) class indices in [0, C)
    N, C, H, W = 2, 4, 16, 16
    prediction = jax.random.normal(k1, (N, C, H, W), dtype=jnp.float32)
    target = jax.random.randint(k2, (N, H, W), 0, C, dtype=jnp.int32)

    loss = cross_entropy(prediction, target)
    loss = jax.block_until_ready(loss)

    ref = _reference_cross_entropy(prediction, target)
    assert jnp.allclose(loss, ref, atol=1e-5, rtol=1e-5), (loss, ref)

    print("KERNEL_OK")
</pallas_src>

<mosaic_0001>
module attributes {stable_mosaic.version = 11 : i64} {
  func.func @_ce_kernel(%arg0: i32, %arg1: i32, %arg2: memref<1x4x256xf32, #tpu.memory_space<vmem>>, %arg3: memref<1x1x256xi32, #tpu.memory_space<vmem>>, %arg4: memref<1x128xf32, #tpu.memory_space<vmem>>) attributes {dimension_semantics = [#tpu.dimension_semantics<parallel>, #tpu.dimension_semantics<parallel>], iteration_bounds = array<i64: 2, 1>, scalar_prefetch = 0 : i64, scratch_operands = 0 : i64, tpu.core_type = #tpu.core_type<tc>, window_params = [{transform_indices = @transform_0, window_bounds = array<i64: 1, 4, 256>}, {transform_indices = @transform_1, window_bounds = array<i64: 1, 1, 256>}, {transform_indices = @transform_2, window_bounds = array<i64: 1, 128>}]} {
    %c0 = arith.constant 0 : index
    %c0_0 = arith.constant 0 : index
    %c0_1 = arith.constant 0 : index
    %0 = vector.load %arg2[%c0, %c0_0, %c0_1] : memref<1x4x256xf32, #tpu.memory_space<vmem>>, vector<1x4x256xf32>
    %1 = vector.shape_cast %0 : vector<1x4x256xf32> to vector<4x256xf32>
    %c0_2 = arith.constant 0 : index
    %c0_3 = arith.constant 0 : index
    %c0_4 = arith.constant 0 : index
    %2 = vector.load %arg3[%c0_2, %c0_3, %c0_4] : memref<1x1x256xi32, #tpu.memory_space<vmem>>, vector<1x1x256xi32>
    %3 = vector.shape_cast %2 : vector<1x1x256xi32> to vector<1x256xi32>
    %cst = arith.constant dense<0xFF800000> : vector<256xf32>
    %4 = vector.multi_reduction <maximumf>, %1, %cst [0] : vector<4x256xf32> to vector<256xf32>
    %5 = vector.shape_cast %4 : vector<256xf32> to vector<1x256xf32>
    %6 = vector.broadcast %5 : vector<1x256xf32> to vector<4x256xf32>
    %7 = arith.subf %1, %6 : vector<4x256xf32>
    %8 = math.exp %7 : vector<4x256xf32>
    %cst_5 = arith.constant dense<0.000000e+00> : vector<256xf32>
    %9 = vector.multi_reduction <add>, %8, %cst_5 [0] : vector<4x256xf32> to vector<256xf32>
    %10 = vector.shape_cast %9 : vector<256xf32> to vector<1x256xf32>
    %11 = math.log %10 : vector<1x256xf32>
    %12 = arith.addf %11, %5 : vector<1x256xf32>
    %13 = tpu.iota {dimensions = array<i32: 0>} : vector<4x1xi32>
    %14 = vector.broadcast %13 : vector<4x1xi32> to vector<4x256xi32>
    %15 = vector.broadcast %3 : vector<1x256xi32> to vector<4x256xi32>
    %16 = arith.cmpi eq, %14, %15 : vector<4x256xi32>
    %cst_6 = arith.constant 0.000000e+00 : f32
    %17 = vector.broadcast %cst_6 : f32 to vector<4x256xf32>
    %18 = arith.select %16, %1, %17 : vector<4x256xi1>, vector<4x256xf32>
    %cst_7 = arith.constant dense<0.000000e+00> : vector<256xf32>
    %19 = vector.multi_reduction <add>, %18, %cst_7 [0] : vector<4x256xf32> to vector<256xf32>
    %20 = vector.shape_cast %19 : vector<256xf32> to vector<1x256xf32>
    %c0_i32 = arith.constant 0 : i32
    %21 = vector.broadcast %c0_i32 : i32 to vector<1x256xi32>
    %22 = arith.cmpi sge, %3, %21 : vector<1x256xi32>
    %23 = arith.subf %12, %20 : vector<1x256xf32>
    %cst_8 = arith.constant 0.000000e+00 : f32
    %24 = vector.broadcast %cst_8 : f32 to vector<1x256xf32>
    %25 = arith.select %22, %23, %24 : vector<1x256xi1>, vector<1x256xf32>
    %26 = vector.shape_cast %25 : vector<1x256xf32> to vector<1x1x256xf32>
    %cst_9 = arith.constant dense<0.000000e+00> : vector<1xf32>
    %27 = vector.multi_reduction <add>, %26, %cst_9 [1, 2] : vector<1x1x256xf32> to vector<1xf32>
    %28 = vector.shape_cast %27 : vector<1xf32> to vector<1x1x1xf32>
    %29 = vector.extract %28[0, 0, 0] : f32 from vector<1x1x1xf32>
    %cst_10 = arith.constant 7.812500e-03 : f32
    %30 = arith.mulf %29, %cst_10 : f32
    %31 = vector.broadcast %30 : f32 to vector<1x128xf32>
    %c0_11 = arith.constant 0 : index
    %c0_12 = arith.constant 0 : index
    %32 = vector.load %arg4[%c0_11, %c0_12] : memref<1x128xf32, #tpu.memory_space<vmem>>, vector<1x128xf32>
    tpu.vector_store %arg4[%c0_11, %c0_12], %31 {strides = array<i32>} : memref<1x128xf32, #tpu.memory_space<vmem>>, vector<1x128xf32>,
    return
  }
  func.func @transform_0(%arg0: i32, %arg1: i32) -> (i32, i32, i32) {
    %c0_i32 = arith.constant 0 : i32
    %c0_i32_0 = arith.constant 0 : i32
    return %arg0, %c0_i32, %arg1 : i32, i32, i32
  }
  func.func @transform_1(%arg0: i32, %arg1: i32) -> (i32, i32, i32) {
    %c0_i32 = arith.constant 0 : i32
    %c0_i32_0 = arith.constant 0 : i32
    return %arg0, %c0_i32, %arg1 : i32, i32, i32
  }
  func.func @transform_2(%arg0: i32, %arg1: i32) -> (i32, i32) {
    %c1_i32 = arith.constant 1 : i32
    %0 = arith.muli %arg0, %c1_i32 : i32
    %1 = arith.addi %0, %arg1 : i32
    %c0_i32 = arith.constant 0 : i32
    %c0_i32_0 = arith.constant 0 : i32
    return %c0_i32, %1 : i32, i32
  }
}

</mosaic_0001>

<bundles_post_ra>
// kernel: tpu_custom_call.1
= control target key start
LH: loop header
LB: loop body
LE: loop exit
PB: predicated region body
PF: predicated region fallthrough
CT: control target
= control target key end

     0   :  { %7 = vsyncpa [#allocation3], 0  ;;  %s855_s0 = inlined_call_operand.hbm [shape: f32[2,4,256], index: 0, kind: input, shape index: {}]   ;;  %s856_s1 = inlined_call_operand.hbm [shape: s32[2,1,256], index: 1, kind: input, shape index: {}]   ;;  %s857_s2 = inlined_call_operand.hbm [shape: f32[1,256], index: 2, kind: output, shape index: {}]  }
   0x1   :  { %9 = vsyncpa [#allocation3 + $0x1], 0 }
   0x2   :  { %10 = vsyncpa [#allocation6], 0 }
   0x3   :  { %12 = vsyncpa [#allocation6 + $0x1], 0 }
   0x4   :  { %13 = vsyncpa [#allocation4], 0 }
   0x5   :  { %15 = vsyncpa [#allocation4 + $0x1], 0  ;;  %s709_s9 = smov 0   ;;  %s711_s10 = smov 0  }
   0x6   :  { %s713_s11 = smov 0   ;;  %s715_s12 = smov 0  }
   0x7   :  { %s717_s13 = smov 0   ;;  %s719_s14 = smov 0  }
   0x8 LB: > { %s456_s15 = sadd.s32 4294967295, %s692_s14   ;;  %s457_s16 = sadd.s32 4294967294, %s692_s14   ;;  %s692_s14 = sphi %s719_s14, %s21_s14   ;;  %s688_s13 = sphi %s717_s13, %s867_s13   ;;  %s684_s12 = sphi %s715_s12, %s866_s12   ;;  %s680_s11 = sphi %s713_s11, %s865_s11   ;;  %s676_s10 = sphi %s711_s10, %s864_s10   ;;  %s672_s9 = sphi %s709_s9, %s863_s9  }
   0x9   : > { %s33_s17 = sadd.s32 1, %s688_s13  ;;  %s42_s18 = sadd.s32 1, %s680_s11 }
   0xa   : > { %p35_p0 = scmp.ge.s32.totalorder %s33_s17, 2  ;;  %p49_p1 = scmp.ne.s32.totalorder %s680_s11, %s676_s10 }
   0xb   : > { %p50_p2 = scmp.eq.s32.totalorder %s692_s14, 0  ;;  %p55_p3 = scmp.ne.s32.totalorder %s676_s10, %s672_s9 }
   0xc   : > { %s869_s17 = smov (%p35_p0, %s33_s17), 0  ;;  %p56_p5 = scmp.eq.s32.totalorder %s456_s15, 0 }
   0xd   : > { %p750_p4 = por %p50_p2, %p49_p1  ;;  %s37_s20 = ssub.s32 %s688_s13, %s869_s17 }
   0xe   : > { %p109_p6 = scmp.eq.s32.totalorder %s456_s15, 1  ;;  %p40_p7 = scmp.eq.s32.totalorder %s37_s20, 0 }
   0xf   : > { %p756_p8 = por %p56_p5, %p55_p3  ;;  %p115_p10 = scmp.eq.s32.totalorder %s457_s16, 1 }
  0x10   : > { %p760_p9 = por %p109_p6, %p49_p1  ;;  %p459_p12 = scmp.ge.s32.totalorder %s692_s14, 2 }
  0x11   : > { %s765_s23 = scalar_select %p40_p7, %s680_s11, %s42_s18  }
  0x12   : > { %p767_p11 = por %p115_p10, %p55_p3  ;;  %p490_p13 = scmp.lt.s32.totalorder %s692_s14, 2 }
  0x13   : > { %s135_s25 = sand.u32 1, %s680_s11   ;;  %s470_s27 = sshll.u32 %s688_s13, 3 }
  0x14   : > { %s460_s26 = sshll.u32 %s135_s25, 3  ;;  %s146_s30 = scalar_lea.hbm %s855_s0, %s470_s27 }
  0x15   : > { %s139_s3 = scalar_lea.vmem [#allocation2], %s460_s26  ;;  %s148_s5 = sshll.u32 %s146_s30, 4  ;;  %s149_s5 = int_to_ptr.hbm [resolvable:$true] %s148_s5 }
  0x16   : > { %s150_s4 = sshll.u32 %s139_s3, 4  ;;  %p780_p0 = pnand %p490_p13, %p750_p4  ;;  %s151_s4 = int_to_ptr.vmem [resolvable:$true] %s150_s4 }
  0x17   : > { %p465_p1 = scmp.ge.s32.totalorder %s692_s14, 1  ;;  %p176_p2 = scmp.lt.s32.totalorder %s692_s14, 3 }
  0x18   : > { %s136_s7 = scalar_lea.sflag [#allocation3], %s135_s25  ;;  %s463_s8 = sshll.u32 %s135_s25, 1 }
  0x19   : > { %482 = dma.hbm_to_vmem [thread:$0]  (!%p780_p0), %s149_s5, 128, %s151_s4, %s136_s7  }
  0x1a   : > { %p177_p3 = pnand %p465_p1, %p176_p2  ;;  %s464_s15 = sshll.u32 %s688_s13, 1 }
  0x1b   : > { %s167_s20 = scalar_lea.hbm %s856_s1, %s464_s15  ;;  %s161_s26 = scalar_lea.vmem [#allocation5], %s463_s8 }
  0x1c   : > { %s171_s19 = sshll.u32 %s161_s26, 4  ;;  %s169_s27 = sshll.u32 %s167_s20, 4  ;;  %s172_s19 = int_to_ptr.vmem [resolvable:$true] %s171_s19  ;;  %s170_s27 = int_to_ptr.hbm [resolvable:$true] %s169_s27 }
  0x1d   : > { %s158_s28 = scalar_lea.sflag [#allocation6], %s135_s25  ;;  %180 = sbr.rel (%p177_p3) target bundleno = 302 (0x12e), region = 28 }
  0x1e   : > { %485 = dma.hbm_to_vmem [thread:$0]  (!%p780_p0), %s170_s27, 32, %s172_s19, %s158_s28  }
  0x1f   : > { %s795_s29 = sand.u32 (!%p177_p3), 1, %s676_s10  }
  0x20   : > { %s466_s30 = sshll.u32 (!%p177_p3), %s795_s29, 3  ;;  %s183_s3 = scalar_lea.sflag (!%p177_p3), [#allocation3], %s795_s29 }
  0x21   : > { %s186_s4 = scalar_lea.vmem (!%p177_p3), [#allocation2], %s466_s30 }
  0x22   : > { %659 = dma.done.wait (%p756_p8), %s183_s3, 128  }
  0x23   : > { %661 = vsyncadd (%p756_p8), %s183_s3, 4294967168  ;;  %s467_s25 = sshll.u32 %s795_s29, 1  ;;  %s193_s5 = scalar_lea.sflag [#allocation6], %s795_s29 }
  0x24   : > { %s196_s6 = scalar_lea.vmem [#allocation5], %s467_s25 }
  0x25   : > { %663 = dma.done.wait (%p756_p8), %s193_s5, 32  }
  0x26   : > { %665 = vsyncadd (%p756_p8), %s193_s5, 4294967264  ;;  %v225_v0 = vld [vmem:[%s186_s4] sm:$0xff]  ;;  %vm233_vm0 = vcmask 1043456   ;;  %v282_v22 = vlaneseq  ;;  %v226_v23 = vld [vmem:[%s196_s6] sm:$0x3]  ;;  %vm315_vm3 = vcmask 1040384   ;;  %s349_s8 = scalar_lea.hbm %s857_s2, %s684_s12 }
  0x27   : > { %228 = vst [vmem:[#allocation1] ss:$2 sm:$0xff] %v225_v0  ;;  %v284_v31 = vperm.slane %v226_v23, 0  ;;  %v285_v32 = vperm.slane %v226_v23, 1  ;;  %vm309_vm4 = vcmp.ge.s32.totalorder %v226_v23, 0  ;;  %s221_s15 = scalar_lea.vmem [#allocation7], %s795_s29 }
  0x28   : > { %v283_v28 = vshrl.u32 %v282_v22, 7  ;;  %s351_s16 = sshll.u32 %s221_s15, 4  ;;  %s353_s18 = sshll.u32 %s349_s8, 4  ;;  %s352_s16 = int_to_ptr.vmem [resolvable:$true] %s351_s16  ;;  %s354_s18 = int_to_ptr.hbm [resolvable:$true] %s353_s18 }
  0x29   : > { %s340_s19 = scalar_lea.sflag [#allocation4], %s795_s29  ;;  %s620_s27 = sshra.s32 %s354_s18, 4  ;;  %s621_s27 = int_to_ptr.hbm [resolvable:$true] %s620_s27 }
  0x2a   : > { %vm286_vm1 = vcmp.eq.s32.totalorder %v283_v28, %v284_v31  ;;  %vm287_vm2 = vcmp.eq.s32.totalorder %v283_v28, %v285_v32  ;;  %s622_s28 = scalar_lea.hbm %s621_s27, 1  ;;  %s626_s12 = scalar_lea.hbm %s857_s2, 2 }
  0x2b   : > { %p623_p4 = scmp.ne.s32.totalorder %s621_s27, %s622_s28  ;;  %p627_p7 = scmp.lt.s32.totalorder %s621_s27, %s857_s2 }
  0x2c   : > { %p628_p8 = scmp.lt.s32.totalorder %s626_s12, %s622_s28 }
  0x2d   : > { %p624_p5 = pnand %p623_p4, %p760_p9 }
  0x2e   : > { %v229_v1 = vld.sshfl [vmem:[#allocation1] sm:$0xff pattern:$0x75316420]  ;;  %v230_v2 = vld.sshfl [vmem:[#allocation1 + $0x8] sm:$0xff pattern:$0x75316420]  ;;  %p629_p10 = por %p628_p8, %p627_p7 }
  0x2f   : > { %v234_v3 = vsel %vm233_vm0, %v229_v1, -inf  ;;  %v241_v4 = vsel %vm233_vm0, %v230_v2, -inf  ;;  %p625_p6 = pneg %p624_p5 }
  0x30   : > { %v235_v5 = vrot.slane %v234_v3, 4  ;;  %v242_v6 = vrot.slane %v241_v4, 4 }
  0x31   : > { %p630_p13 = pnand %p629_p10, %p625_p6 }
  0x32   : > { %v236_v7 = vmax.f32 %v234_v3, %v235_v5  ;;  %v243_v8 = vmax.f32 %v241_v4, %v242_v6 }
  0x34   : > { %v237_v9 = vrot.slane %v236_v7, 2  ;;  %v244_v10 = vrot.slane %v243_v8, 2 }
  0x36   : > { %v238_v11 = vmax.f32 %v236_v7, %v237_v9  ;;  %v245_v12 = vmax.f32 %v243_v8, %v244_v10 }
  0x38   : > { %v239_v13 = vrot.slane %v238_v11, 1  ;;  %v246_v14 = vrot.slane %v245_v12, 1 }
  0x3a   : > { %v240_v15 = vmax.f32 %v238_v11, %v239_v13  ;;  %v247_v16 = vmax.f32 %v245_v12, %v246_v14 }
  0x3c   : > { %v250_v17 = vrot.slane %v247_v16, 4 }
  0x3e   : > { %v251_v18 = vsel %vm233_vm0, %v240_v15, %v250_v17 }
  0x3f   : > { %v253_v19 = vsub.f32 %v225_v0, %v251_v18 }
  0x41   : > { %v254_v20 = vmul.f32 1.442695, %v253_v19 }
  0x43   : > { %540 = vpow2.f32 %v254_v20 }
  0x49   : > { %v541_v21 = vpop.eup %540 }
  0x4a   : > { %257 = vst [vmem:[#allocation1] ss:$2 sm:$0xff] %v541_v21 }
  0x51   : > { %v258_v24 = vld.sshfl [vmem:[#allocation1] sm:$0xff pattern:$0x75316420]  ;;  %v259_v25 = vld.sshfl [vmem:[#allocation1 + $0x8] sm:$0xff pattern:$0x75316420] }
  0x52   : > { %v262_v26 = vsel %vm233_vm0, %v258_v24, 0.0  ;;  %v269_v27 = vsel %vm233_vm0, %v259_v25, 0.0  ;;  %288 = vst [vmem:[#allocation1] ss:$2 sm:$0xff] %v225_v0 }
  0x53   : > { %v263_v29 = vrot.slane %v262_v26, 4  ;;  %v270_v30 = vrot.slane %v269_v27, 4 }
  0x55   : > { %v264_v33 = vadd.f32 %v263_v29, %v262_v26  ;;  %v271_v34 = vadd.f32 %v270_v30, %v269_v27 }
  0x57   : > { %v265_v35 = vrot.slane %v264_v33, 2  ;;  %v272_v36 = vrot.slane %v271_v34, 2 }
  0x59   : > { %v266_v37 = vadd.f32 %v265_v35, %v264_v33  ;;  %v273_v38 = vadd.f32 %v272_v36, %v271_v34  ;;  %v289_v39 = vld.sshfl [vmem:[#allocation1] sm:$0xff pattern:$0x75316420]  ;;  %v290_v40 = vld.sshfl [vmem:[#allocation1 + $0x8] sm:$0xff pattern:$0x75316420] }
  0x5a   : > { %v293_v41 = vsel %vm286_vm1, %v289_v39, 0.0  ;;  %v294_v42 = vsel %vm287_vm2, %v290_v40, 0.0 }
  0x5b   : > { %v267_v43 = vrot.slane %v266_v37, 1  ;;  %v274_v44 = vrot.slane %v273_v38, 1  ;;  %v295_v45 = vsel %vm233_vm0, %v293_v41, 0.0  ;;  %v302_v46 = vsel %vm233_vm0, %v294_v42, 0.0 }
  0x5c   : > { %v296_v47 = vrot.slane %v295_v45, 4  ;;  %v303_v48 = vrot.slane %v302_v46, 4 }
  0x5d   : > { %v268_v49 = vadd.f32 %v267_v43, %v266_v37  ;;  %v275_v50 = vadd.f32 %v274_v44, %v273_v38 }
  0x5e   : > { %v297_v51 = vadd.f32 %v296_v47, %v295_v45  ;;  %v304_v52 = vadd.f32 %v303_v48, %v302_v46 }
  0x5f   : > { %542 = vlog2.f32 %v268_v49 }
  0x60   : > { %544 = vlog2.f32 %v275_v50  ;;  %v298_v53 = vrot.slane %v297_v51, 2  ;;  %v305_v54 = vrot.slane %v304_v52, 2 }
  0x62   : > { %v299_v55 = vadd.f32 %v298_v53, %v297_v51  ;;  %v306_v56 = vadd.f32 %v305_v54, %v304_v52 }
  0x64   : > { %v300_v57 = vrot.slane %v299_v55, 1  ;;  %v307_v58 = vrot.slane %v306_v56, 1 }
  0x65   : > { %v543_v59 = vpop.eup %542 }
  0x66   : > { %v545_v60 = vpop.eup %544  ;;  %v277_v61 = vmul.f32 0.6931472, %v543_v59  ;;  %v301_v63 = vadd.f32 %v300_v57, %v299_v55  ;;  %v308_v0 = vadd.f32 %v307_v58, %v306_v56 }
  0x67   : > { %v279_v62 = vmul.f32 0.6931472, %v545_v60 }
  0x68   : > { %v280_v1 = vadd.f32 %v277_v61, %v240_v15 }
  0x69   : > { %v281_v2 = vadd.f32 %v279_v62, %v247_v16 }
  0x6a   : > { %v310_v3 = vsub.f32 %v280_v1, %v301_v63 }
  0x6b   : > { %v311_v4 = vsub.f32 %v281_v2, %v308_v0 }
  0x6d   : > { %v314_v5 = vrot.slane %v311_v4, 7 }
  0x6f   : > { %v316_v6 = vsel %vm315_vm3, %v310_v3, %v314_v5 }
  0x70   : > { %v318_v7 = vsel %vm309_vm4, %v316_v6, 0.0 }
  0x71   : > { %v320_v8 = vperm.slane %v318_v7, 0  ;;  %v321_v9 = vperm.slane %v318_v7, 1 }
  0x73   : > { %v324_v10 = vsel %vm315_vm3, %v320_v8, 0.0  ;;  %v325_v11 = vsel %vm315_vm3, %v321_v9, 0.0 }
  0x74   : > { %v326_v12 = vadd.f32 %v325_v11, %v324_v10 }
  0x76   : > { %327 = vadd.xlane.f32.xlu0 %v326_v12 }
  0xe9   : > { %v328_v13 = vpop.xlane.xlu0 %327 }
  0xea   : > { %v329_v14 = vrot.slane %v328_v13, 4 }
  0xec   : > { %v330_v17 = vadd.f32 %v329_v14, %v328_v13 }
  0xee   : > { %v331_v15 = vrot.slane %v330_v17, 2 }
  0xf0   : > { %v332_v16 = vadd.f32 %v331_v15, %v330_v17 }
  0xf2   : > { %v333_v18 = vrot.slane %v332_v16, 1 }
  0xf4   : > { %v334_v19 = vadd.f32 %v333_v18, %v332_v16 }
  0xf6   : > { %471 = vpush %v334_v19 }
 0x127   : > { %s472_s20 = spop %471 }
 0x128   : > { %s336_s26 = smul.f32 0.0078125, %s472_s20 }
 0x12a   : > { %v337_v20 = vstv %s336_s26 }
 0x12b   : > { %338 = vst [vmem:[%s221_s15] sm:$0x1] %v337_v20 }
 0x12c   : > { %633 = shalt.err (!%p630_p13)
}
 0x12d   : > { %477 = dma.vmem_to_hbm [thread:$0]  (%p760_p9), %s352_s16, 16, %s354_s18, %s340_s19  }
 0x12e PF: > { %s365_s29 = sand.u32 1, %s672_s9   ;;  %p487_p0 = pnand %p459_p12, %p767_p11 }
 0x12f   : > { %s366_s5 = scalar_lea.sflag [#allocation4], %s365_s29 }
 0x130   : > { %p488_p1 = pneg %p487_p0 }
 0x132   : > { %667 = dma.done.wait (%p488_p1), %s366_s5, 16  }
 0x133   : > { %669 = vsyncadd (%p488_p1), %s366_s5, 4294967280  ;;  %s21_s14 = sadd.s32 1, %s692_s14   ;;  %s863_s9 = smov %s676_s10 }
 0x134   : > { %p18_p2 = scmp.ge.s32.totalorder %s21_s14, 4   ;;  %s864_s10 = smov %s680_s11 }
 0x135   : > { %s865_s11 = smov %s765_s23  ;;  %s866_s12 = smov %s688_s13 }
 0x136   : > { %s867_s13 = smov %s869_s17  ;;  %20 = sbr.rel (!%p18_p2) target bundleno = 8 (0x8), region = 86 }
 0x13b   :  { %371 = vsyncpa [#allocation3], 1 }
 0x13c   :  { %373 = vsyncpa [#allocation3 + $0x1], 1 }
 0x13d   :  { %374 = vsyncpa [#allocation6], 1 }
 0x13e   :  { %376 = vsyncpa [#allocation6 + $0x1], 1 }
 0x13f   :  { %377 = vsyncpa [#allocation4], 1 }
 0x140   :  { %379 = vsyncpa [#allocation4 + $0x1], 1 }

</bundles_post_ra>
